<compile_context>
chip_gen: v5e
topology: v5e:2x2
jax: 0.10.0
libtpu: 0.0.40
codegen_flags: <defaults>
</compile_context>

<pallas_src>
import jax
import jax.numpy as jnp
from jax import lax
from jax.experimental import pallas as pl
from jax.experimental.pallas import tpu as pltpu


def _make_basic_block_kernel(W, L, compute_dtype):
    """Kernel body for one batch tile.

    x_ref : (C, L)    input block, channels x (batch-tile*H*W) lanes
    m_ref : (8, L)    f32 boundary masks for the 8 non-center 3x3 taps
    w1_ref: (P, C)    conv1x1 weight with BN1 scale folded in (compute_dtype)
    b1_ref: (P, 1)    folded BN1 bias (f32)
    w2_ref: (P, 9*P)  conv3x3 taps stacked along K, BN2 scale folded in
    b2_ref: (P, 1)    folded BN2 bias (f32)
    o_ref : (P, L)    output block
    """

    def kernel(x_ref, m_ref, w1_ref, b1_ref, w2_ref, b2_ref, o_ref):
        x_f32 = x_ref[...].astype(jnp.float32)             # residual (f32)

        # ---- conv1x1 + folded BN1 + ReLU : one MXU matmul, N = L ----
        h1 = jnp.dot(w1_ref[...], x_ref[...].astype(compute_dtype),
                     preferred_element_type=jnp.float32)
        h1 = jnp.maximum(h1 + b1_ref[...], 0.0)             # (P, L) f32

        # ---- conv3x3 (padding=1) as ONE stacked K = 9*P MXU matmul ----
        masks = m_ref[...]                                   # (8, L) f32
        patches = []
        mi = 0
        for dh in (-1, 0, 1):
            for dw in (-1, 0, 1):
                if dh == 0 and dw == 0:
                    patches.append(h1)
                else:
                    delta = dh * W + dw
                    # XLU lane roll: patch[r] = h1[(r + delta) % L]
                    pch = pltpu.roll(h1, (-delta) % L, 1)
                    # zero out zero-padding lanes and cross-image wrap
                    pch = pch * masks[mi:mi + 1, :]
                    patches.append(pch)
                    mi += 1
        stacked = jnp.concatenate(patches, axis=0).astype(compute_dtype)  # (9P, L)
        acc = jnp.dot(w2_ref[...], stacked,
                      preferred_element_type=jnp.float32)    # (P, L) f32

        # ---- folded BN2 bias + residual add + ReLU (f32 epilogue) ----
        o_ref[...] = jnp.maximum(acc + b2_ref[...] + x_f32, 0.0).astype(o_ref.dtype)

    return kernel


def basic_block_pallas(x_nchw, conv1_w, bn1, conv2_w, bn2, *, eps=1e-5,
                       compute_dtype=jnp.bfloat16, batch_tile=None,
                       core_parallel_batch=False):
    """BasicBlock forward (eval-mode BN), stride=1, downsample=None."""
    N, C, H, W = x_nchw.shape
    P = conv1_w.shape[0]
    assert conv1_w.shape == (P, C, 1, 1)
    assert conv2_w.shape == (P, P, 3, 3)
    assert P == C, "downsample=None requires inplanes == planes"
    HW = H * W

    Bt = N if batch_tile is None else batch_tile
    assert N % Bt == 0
    L = Bt * HW                                    # lanes per grid step
    assert Bt == N or L % 128 == 0, "lane block must be a multiple of 128"

    # ---- fold eval-mode BatchNorm into conv weights / per-channel bias ----
    g1, be1, m1, v1 = (jnp.asarray(a, jnp.float32) for a in bn1)
    g2, be2, m2, v2 = (jnp.asarray(a, jnp.float32) for a in bn2)
    s1 = g1 / jnp.sqrt(v1 + eps)
    s2 = g2 / jnp.sqrt(v2 + eps)
    b1 = (be1 - m1 * s1).reshape(P, 1)
    b2 = (be2 - m2 * s2).reshape(P, 1)
    w1_eff = (s1[:, None] * conv1_w[:, :, 0, 0]).astype(compute_dtype)       # (P, C)
    w2_taps = jnp.transpose(s2[:, None, None, None] * conv2_w,
                            (2, 3, 0, 1)).reshape(9, P, P)                   # (tap,out,in)
    w2_stk = jnp.transpose(w2_taps, (1, 0, 2)).reshape(P, 9 * P).astype(compute_dtype)

    # ---- channels on sublanes, (batch, flattened spatial) on lanes ----
    x_cl = jnp.transpose(x_nchw, (1, 0, 2, 3)).reshape(C, N * HW)

    # ---- precomputed per-lane boundary masks (grid-invariant input) ----
    lane = jnp.arange(L, dtype=jnp.int32)
    pix = lane % HW
    hh, ww = pix // W, pix % W
    rows = []
    for dh in (-1, 0, 1):
        for dw in (-1, 0, 1):
            if dh == 0 and dw == 0:
                continue
            m = jnp.ones((L,), jnp.bool_)
            if dh == -1:
                m = m & (hh >= 1)
            if dh == 1:
                m = m & (hh <= H - 2)
            if dw == -1:
                m = m & (ww >= 1)
            if dw == 1:
                m = m & (ww <= W - 2)
            rows.append(m)
    masks = jnp.stack(rows, axis=0).astype(jnp.float32)        # (8, L)

    # grid-invariant operands: single-buffer once they get big (P >= 128)
    def _const_spec(shape):
        if P >= 128:
            return pl.BlockSpec(shape, lambda b: (0,) * len(shape),
                                pipeline_mode=pl.Buffered(1))
        return pl.BlockSpec(shape, lambda b: (0,) * len(shape))

    itemsize = jnp.dtype(x_nchw.dtype).itemsize
    w_itemsize = jnp.dtype(compute_dtype).itemsize
    vmem_needed = (2 * (C + P) * L * itemsize                  # double-buffered x / out
                   + 2 * (8 * L * 4 + (P * C + 9 * P * P) * w_itemsize + 8 * P)
                   + 10 * P * L * 4                            # h1 + stacked f32 values
                   + (4 << 20))
    vmem_limit = int(min(max(vmem_needed, 16 << 20), 48 << 20))  # v7x: 64 MiB / TC

    # On v7x with >1 batch tile, CORE_PARALLEL shards the grid across the
    # two TensorCores; plain "parallel" is the portable default.
    dim_sem = (pltpu.CORE_PARALLEL,) if core_parallel_batch else ("parallel",)

    out_flat = pl.pallas_call(
        _make_basic_block_kernel(W, L, compute_dtype),
        out_shape=jax.ShapeDtypeStruct((P, N * HW), x_nchw.dtype),
        grid_spec=pltpu.PrefetchScalarGridSpec(
            num_scalar_prefetch=0,
            grid=(N // Bt,),
            in_specs=[
                pl.BlockSpec((C, L), lambda b: (0, b)),
                _const_spec((8, L)),
                _const_spec((P, C)),
                _const_spec((P, 1)),
                _const_spec((P, 9 * P)),
                _const_spec((P, 1)),
            ],
            out_specs=pl.BlockSpec((P, L), lambda b: (0, b)),
        ),
        compiler_params=pltpu.CompilerParams(
            dimension_semantics=dim_sem,
            vmem_limit_bytes=vmem_limit),
    )(x_cl, masks, w1_eff, b1, w2_stk, b2)

    return jnp.transpose(out_flat.reshape(P, N, H, W), (1, 0, 2, 3))


if __name__ == "__main__":
    key = jax.random.PRNGKey(0)
    N, C, H, W = 2, 8, 16, 16
    P = C                       # inplanes == planes, stride=1, downsample=None
    eps = 1e-5                  # PyTorch BatchNorm2d default

    ks = jax.random.split(key, 11)
    x = jax.random.normal(ks[0], (N, C, H, W), jnp.float32)
    w1 = jax.random.normal(ks[1], (P, C, 1, 1), jnp.float32) * 0.3     # OIHW
    w2 = jax.random.normal(ks[2], (P, P, 3, 3), jnp.float32) * 0.1     # OIHW
    g1 = 1.0 + 0.1 * jax.random.normal(ks[3], (P,), jnp.float32)
    be1 = 0.1 * jax.random.normal(ks[4], (P,), jnp.float32)
    m1 = 0.1 * jax.random.normal(ks[5], (P,), jnp.float32)
    v1 = jax.random.uniform(ks[6], (P,), jnp.float32, 0.5, 1.5)
    g2 = 1.0 + 0.1 * jax.random.normal(ks[7], (P,), jnp.float32)
    be2 = 0.1 * jax.random.normal(ks[8], (P,), jnp.float32)
    m2 = 0.1 * jax.random.normal(ks[9], (P,), jnp.float32)
    v2 = jax.random.uniform(ks[10], (P,), jnp.float32, 0.5, 1.5)
    bn1 = (g1, be1, m1, v1)
    bn2 = (g2, be2, m2, v2)

    # ---- pure-JAX reference (same eval-mode BN semantics), exact f32 ----
    def bn(y, g, b, m, v):
        sh = (1, -1, 1, 1)
        return (g.reshape(sh) * (y - m.reshape(sh))
                / jnp.sqrt(v.reshape(sh) + eps) + b.reshape(sh))

    dn = ("NCHW", "OIHW", "NCHW")
    y = lax.conv_general_dilated(x, w1, (1, 1), "VALID", dimension_numbers=dn,
                                 precision=lax.Precision.HIGHEST)
    y = jnp.maximum(bn(y, g1, be1, m1, v1), 0.0)
    y = lax.conv_general_dilated(y, w2, (1, 1), ((1, 1), (1, 1)),
                                 dimension_numbers=dn,
                                 precision=lax.Precision.HIGHEST)
    ref = jnp.maximum(bn(y, g2, be2, m2, v2) + x, 0.0)

    # f32 MXU path: matches the PyTorch module numerics tightly.
    out_f32 = basic_block_pallas(x, w1, bn1, w2, bn2, compute_dtype=jnp.float32)
    jax.block_until_ready(out_f32)
    err_f32 = float(jnp.max(jnp.abs(out_f32 - ref)))
    assert jnp.allclose(out_f32, ref, rtol=2e-3, atol=2e-3), err_f32

    # bf16 MXU path (default for inference): looser tolerance.
    out_bf16 = basic_block_pallas(x, w1, bn1, w2, bn2)
    jax.block_until_ready(out_bf16)
    err_bf16 = float(jnp.max(jnp.abs(out_bf16 - ref)))
    assert jnp.allclose(out_bf16, ref, rtol=5e-2, atol=3e-1), err_bf16

    print("KERNEL_OK")
</pallas_src>

<mosaic_0001>
module attributes {stable_mosaic.version = 11 : i64} {
  func.func @kernel(%arg0: i32, %arg1: memref<8x512xf32, #tpu.memory_space<vmem>>, %arg2: memref<8x512xf32, #tpu.memory_space<vmem>>, %arg3: memref<8x8xf32, #tpu.memory_space<vmem>>, %arg4: memref<8x1xf32, #tpu.memory_space<vmem>>, %arg5: memref<8x72xf32, #tpu.memory_space<vmem>>, %arg6: memref<8x1xf32, #tpu.memory_space<vmem>>, %arg7: memref<8x512xf32, #tpu.memory_space<vmem>>) attributes {dimension_semantics = [#tpu.dimension_semantics<parallel>], iteration_bounds = array<i64: 1>, scalar_prefetch = 0 : i64, scratch_operands = 0 : i64, tpu.core_type = #tpu.core_type<tc>, window_params = [{transform_indices = @transform_0, window_bounds = array<i64: 8, 512>}, {pipeline_mode = #tpu.pipeline_mode<synchronous>, transform_indices = @transform_1, window_bounds = array<i64: 8, 512>}, {pipeline_mode = #tpu.pipeline_mode<synchronous>, transform_indices = @transform_2, window_bounds = array<i64: 8, 8>}, {pipeline_mode = #tpu.pipeline_mode<synchronous>, transform_indices = @transform_3, window_bounds = array<i64: 8, 1>}, {pipeline_mode = #tpu.pipeline_mode<synchronous>, transform_indices = @transform_4, window_bounds = array<i64: 8, 72>}, {pipeline_mode = #tpu.pipeline_mode<synchronous>, transform_indices = @transform_5, window_bounds = array<i64: 8, 1>}, {transform_indices = @transform_6, window_bounds = array<i64: 8, 512>}]} {
    %c0 = arith.constant 0 : index
    %c0_0 = arith.constant 0 : index
    %0 = vector.load %arg1[%c0, %c0_0] : memref<8x512xf32, #tpu.memory_space<vmem>>, vector<8x512xf32>
    %c0_1 = arith.constant 0 : index
    %c0_2 = arith.constant 0 : index
    %1 = vector.load %arg3[%c0_1, %c0_2] : memref<8x8xf32, #tpu.memory_space<vmem>>, vector<8x8xf32>
    %c0_3 = arith.constant 0 : index
    %c0_4 = arith.constant 0 : index
    %2 = vector.load %arg1[%c0_3, %c0_4] : memref<8x512xf32, #tpu.memory_space<vmem>>, vector<8x512xf32>
    %cst = arith.constant dense<0.000000e+00> : vector<8x512xf32>
    %3 = tpu.matmul %1, %2, %cst {dimension_numbers = #tpu.dot_dimension_numbers<[1], [0], [0], [1], [0, 0, 1, 1], [], []>} : vector<8x8xf32>, vector<8x512xf32>, vector<8x512xf32> -> vector<8x512xf32>
    %c0_5 = arith.constant 0 : index
    %c0_6 = arith.constant 0 : index
    %4 = vector.load %arg4[%c0_5, %c0_6] : memref<8x1xf32, #tpu.memory_space<vmem>>, vector<8x1xf32>
    %5 = vector.broadcast %4 : vector<8x1xf32> to vector<8x512xf32>
    %6 = arith.addf %3, %5 : vector<8x512xf32>
    %cst_7 = arith.constant 0.000000e+00 : f32
    %7 = vector.broadcast %cst_7 : f32 to vector<8x512xf32>
    %8 = arith.maximumf %6, %7 : vector<8x512xf32>
    %c0_8 = arith.constant 0 : index
    %c0_9 = arith.constant 0 : index
    %9 = vector.load %arg2[%c0_8, %c0_9] : memref<8x512xf32, #tpu.memory_space<vmem>>, vector<8x512xf32>
    %c17_i32 = arith.constant 17 : i32
    %10 = tpu.dynamic_rotate %8 by %c17_i32 dim 1 : vector<8x512xf32>, i32 -> vector<8x512xf32>
    %11 = vector.extract_strided_slice %9 {offsets = [0, 0], sizes = [1, 512], strides = [1, 1]} : vector<8x512xf32> to vector<1x512xf32>
    %12 = vector.broadcast %11 : vector<1x512xf32> to vector<8x512xf32>
    %13 = arith.mulf %10, %12 : vector<8x512xf32>
    %c16_i32 = arith.constant 16 : i32
    %14 = tpu.dynamic_rotate %8 by %c16_i32 dim 1 : vector<8x512xf32>, i32 -> vector<8x512xf32>
    %15 = vector.extract_strided_slice %9 {offsets = [1, 0], sizes = [1, 512], strides = [1, 1]} : vector<8x512xf32> to vector<1x512xf32>
    %16 = vector.broadcast %15 : vector<1x512xf32> to vector<8x512xf32>
    %17 = arith.mulf %14, %16 : vector<8x512xf32>
    %c15_i32 = arith.constant 15 : i32
    %18 = tpu.dynamic_rotate %8 by %c15_i32 dim 1 : vector<8x512xf32>, i32 -> vector<8x512xf32>
    %19 = vector.extract_strided_slice %9 {offsets = [2, 0], sizes = [1, 512], strides = [1, 1]} : vector<8x512xf32> to vector<1x512xf32>
    %20 = vector.broadcast %19 : vector<1x512xf32> to vector<8x512xf32>
    %21 = arith.mulf %18, %20 : vector<8x512xf32>
    %c1_i32 = arith.constant 1 : i32
    %22 = tpu.dynamic_rotate %8 by %c1_i32 dim 1 : vector<8x512xf32>, i32 -> vector<8x512xf32>
    %23 = vector.extract_strided_slice %9 {offsets = [3, 0], sizes = [1, 512], strides = [1, 1]} : vector<8x512xf32> to vector<1x512xf32>
    %24 = vector.broadcast %23 : vector<1x512xf32> to vector<8x512xf32>
    %25 = arith.mulf %22, %24 : vector<8x512xf32>
    %c511_i32 = arith.constant 511 : i32
    %26 = tpu.dynamic_rotate %8 by %c511_i32 dim 1 : vector<8x512xf32>, i32 -> vector<8x512xf32>
    %27 = vector.extract_strided_slice %9 {offsets = [4, 0], sizes = [1, 512], strides = [1, 1]} : vector<8x512xf32> to vector<1x512xf32>
    %28 = vector.broadcast %27 : vector<1x512xf32> to vector<8x512xf32>
    %29 = arith.mulf %26, %28 : vector<8x512xf32>
    %c497_i32 = arith.constant 497 : i32
    %30 = tpu.dynamic_rotate %8 by %c497_i32 dim 1 : vector<8x512xf32>, i32 -> vector<8x512xf32>
    %31 = vector.extract_strided_slice %9 {offsets = [5, 0], sizes = [1, 512], strides = [1, 1]} : vector<8x512xf32> to vector<1x512xf32>
    %32 = vector.broadcast %31 : vector<1x512xf32> to vector<8x512xf32>
    %33 = arith.mulf %30, %32 : vector<8x512xf32>
    %c496_i32 = arith.constant 496 : i32
    %34 = tpu.dynamic_rotate %8 by %c496_i32 dim 1 : vector<8x512xf32>, i32 -> vector<8x512xf32>
    %35 = vector.extract_strided_slice %9 {offsets = [6, 0], sizes = [1, 512], strides = [1, 1]} : vector<8x512xf32> to vector<1x512xf32>
    %36 = vector.broadcast %35 : vector<1x512xf32> to vector<8x512xf32>
    %37 = arith.mulf %34, %36 : vector<8x512xf32>
    %c495_i32 = arith.constant 495 : i32
    %38 = tpu.dynamic_rotate %8 by %c495_i32 dim 1 : vector<8x512xf32>, i32 -> vector<8x512xf32>
    %39 = vector.extract_strided_slice %9 {offsets = [7, 0], sizes = [1, 512], strides = [1, 1]} : vector<8x512xf32> to vector<1x512xf32>
    %40 = vector.broadcast %39 : vector<1x512xf32> to vector<8x512xf32>
    %41 = arith.mulf %38, %40 : vector<8x512xf32>
    %42 = tpu.concatenate %13, %17, %21, %25, %8, %29, %33, %37, %41 in 0 : vector<8x512xf32>, vector<8x512xf32>, vector<8x512xf32>, vector<8x512xf32>, vector<8x512xf32>, vector<8x512xf32>, vector<8x512xf32>, vector<8x512xf32>, vector<8x512xf32> -> vector<72x512xf32>
    %c0_10 = arith.constant 0 : index
    %c0_11 = arith.constant 0 : index
    %43 = vector.load %arg5[%c0_10, %c0_11] : memref<8x72xf32, #tpu.memory_space<vmem>>, vector<8x72xf32>
    %cst_12 = arith.constant dense<0.000000e+00> : vector<8x512xf32>
    %44 = tpu.matmul %43, %42, %cst_12 {dimension_numbers = #tpu.dot_dimension_numbers<[1], [0], [0], [1], [0, 0, 1, 1], [], []>} : vector<8x72xf32>, vector<72x512xf32>, vector<8x512xf32> -> vector<8x512xf32>
    %c0_13 = arith.constant 0 : index
    %c0_14 = arith.constant 0 : index
    %45 = vector.load %arg6[%c0_13, %c0_14] : memref<8x1xf32, #tpu.memory_space<vmem>>, vector<8x1xf32>
    %46 = vector.broadcast %45 : vector<8x1xf32> to vector<8x512xf32>
    %47 = arith.addf %44, %46 : vector<8x512xf32>
    %48 = arith.addf %47, %0 : vector<8x512xf32>
    %cst_15 = arith.constant 0.000000e+00 : f32
    %49 = vector.broadcast %cst_15 : f32 to vector<8x512xf32>
    %50 = arith.maximumf %48, %49 : vector<8x512xf32>
    %c0_16 = arith.constant 0 : index
    %c0_17 = arith.constant 0 : index
    %51 = vector.load %arg7[%c0_16, %c0_17] : memref<8x512xf32, #tpu.memory_space<vmem>>, vector<8x512xf32>
    tpu.vector_store %arg7[%c0_16, %c0_17], %50 {strides = array<i32>} : memref<8x512xf32, #tpu.memory_space<vmem>>, vector<8x512xf32>,
    return
  }
  func.func @transform_0(%arg0: i32) -> (i32, i32) {
    %c0_i32 = arith.constant 0 : i32
    %c0_i32_0 = arith.constant 0 : i32
    return %c0_i32, %arg0 : i32, i32
  }
  func.func @transform_1(%arg0: i32) -> (i32, i32) {
    %c0_i32 = arith.constant 0 : i32
    %c0_i32_0 = arith.constant 0 : i32
    %c0_i32_1 = arith.constant 0 : i32
    return %c0_i32, %c0_i32_0 : i32, i32
  }
  func.func @transform_2(%arg0: i32) -> (i32, i32) {
    %c0_i32 = arith.constant 0 : i32
    %c0_i32_0 = arith.constant 0 : i32
    %c0_i32_1 = arith.constant 0 : i32
    return %c0_i32, %c0_i32_0 : i32, i32
  }
  func.func @transform_3(%arg0: i32) -> (i32, i32) {
    %c0_i32 = arith.constant 0 : i32
    %c0_i32_0 = arith.constant 0 : i32
    %c0_i32_1 = arith.constant 0 : i32
    return %c0_i32, %c0_i32_0 : i32, i32
  }
  func.func @transform_4(%arg0: i32) -> (i32, i32) {
    %c0_i32 = arith.constant 0 : i32
    %c0_i32_0 = arith.constant 0 : i32
    %c0_i32_1 = arith.constant 0 : i32
    return %c0_i32, %c0_i32_0 : i32, i32
  }
  func.func @transform_5(%arg0: i32) -> (i32, i32) {
    %c0_i32 = arith.constant 0 : i32
    %c0_i32_0 = arith.constant 0 : i32
    %c0_i32_1 = arith.constant 0 : i32
    return %c0_i32, %c0_i32_0 : i32, i32
  }
  func.func @transform_6(%arg0: i32) -> (i32, i32) {
    %c0_i32 = arith.constant 0 : i32
    %c0_i32_0 = arith.constant 0 : i32
    return %c0_i32, %arg0 : i32, i32
  }
}

</mosaic_0001>

<bundles_post_ra>
// kernel: tpu_custom_call.1
= control target key start
LH: loop header
LB: loop body
LE: loop exit
PB: predicated region body
PF: predicated region fallthrough
CT: control target
= control target key end

     0   :  { %11 = vsyncpa [#allocation3], 0  ;;  %s859_s0 = inlined_call_operand.hbm [shape: f32[8,512], index: 0, kind: input, shape index: {}]   ;;  %s860_s1 = inlined_call_operand.hbm [shape: f32[8,512], index: 1, kind: input, shape index: {}]   ;;  %s861_s2 = inlined_call_operand.vmem [shape: f32[8,8], index: 2, kind: input, shape index: {}]   ;;  %s862_s3 = inlined_call_operand.vmem [shape: f32[8,1], index: 3, kind: input, shape index: {}]   ;;  %s863_s4 = inlined_call_operand.vmem [shape: f32[8,72], index: 4, kind: input, shape index: {}]   ;;  %s864_s5 = inlined_call_operand.vmem [shape: f32[8,1], index: 5, kind: input, shape index: {}]   ;;  %s865_s6 = inlined_call_operand.hbm [shape: f32[8,512], index: 6, kind: output, shape index: {}]  }
   0x1   :  { %12 = vsyncpa [#allocation6], 0 }
   0x2   :  { %13 = vsyncpa [#allocation4], 0  ;;  %s19_s23 = sshll.u32 %s859_s0, 4  ;;  %s545_s24 = smov [#allocation2]   ;;  %s20_s23 = int_to_ptr.hbm [resolvable:$true] %s19_s23 }
   0x3   :  { %s21_s25 = sshll.u32 %s545_s24, 4  ;;  %s30_s28 = sshll.u32 %s860_s1, 4  ;;  %s22_s25 = int_to_ptr.vmem [resolvable:$true] %s21_s25  ;;  %s31_s28 = int_to_ptr.hbm [resolvable:$true] %s30_s28 }
   0x4   :  { %24 = dma.hbm_to_vmem [thread:$0]  %s20_s23, 512, %s22_s25, [#allocation3]  }
   0x5   :  { %s546_s29 = smov [#allocation5]  }
   0x6   :  { %s32_s30 = sshll.u32 %s546_s29, 4  ;;  %s33_s30 = int_to_ptr.vmem [resolvable:$true] %s32_s30 }
   0x7   :  { %35 = dma.hbm_to_vmem [thread:$0]  %s31_s28, 512, %s33_s30, [#allocation6]  }
   0x8   :  { %539 = dma.done.wait [#allocation3], 512  }
   0x9   :  { %540 = vsyncadd [#allocation3], 4294966784 }
   0xa   :  { %541 = dma.done.wait [#allocation6], 512  }
   0xb   :  { %542 = vsyncadd [#allocation6], 4294966784  ;;  %v547_v0 = vmov 0   ;;  %v598_v1 = vld [vmem:[#allocation2] sm:$0xff]  ;;  %v600_v2 = vld [vmem:[#allocation2 + $0x8] sm:$0xff]  ;;  %vm63_vm0 = vcmask 64512   ;;  %v163_v27 = vlaneseq }
   0xc   :  { %466 = vset.pattern.permute.xlu0 %v547_v0  ;;  %v602_v3 = vld [vmem:[#allocation2 + $0x10] sm:$0xff]  ;;  %82 = vmatpush.msra.mxu0 %v598_v1  ;;  %v606_v4 = vld [vmem:[#allocation2 + $0x18] sm:$0xff]  ;;  %v56_v5 = vld [vmem:[%s861_s2] sm:$0xff]  ;;  %s548_s2 = smov 113   ;;  %s549_s9 = smov 112   ;;  %vm332_vm9 = vcmask 588800  }
   0xd   :  { %102 = vmatpush.msra.mxu1 %v600_v2  ;;  %122 = vmatpush.msra.mxu2 %v602_v3  ;;  %v57_v6 = vld [vmem:[%s862_s3] sm:$0xff]  ;;  %s550_s10 = smov 111   ;;  %s551_s3 = smov 127   ;;  %v689_v31 = vand.u32 127, %v163_v27  ;;  %v721_v54 = vld [vmem:[#allocation5 + $0x8] sm:$0xff] }
   0xe   :  { %142 = vmatpush.msra.mxu3 %v606_v4  ;;  %446 = vmatmul.msk.f32.vlgmr.msra.gmra.mxu0 %vm63_vm0, %v56_v5  ;;  %s552_s11 = smov 1   ;;  %s553_s12 = smov 16   ;;  %v326_v20 = vld [vmem:[%s864_s5] sm:$0xff]  ;;  %v318_v55 = vperm.slane %v721_v54, 7  ;;  %v297_v58 = vperm.slane %v721_v54, 6  ;;  %v276_v63 = vperm.slane %v721_v54, 5 }
   0xf   :  { %447 = vmatmul.msk.f32.vlgmr.msra.gmra.mxu1 %vm63_vm0, %v56_v5  ;;  %448 = vmatmul.msk.f32.vlgmr.msra.gmra.mxu2 %vm63_vm0, %v56_v5  ;;  %s554_s13 = smov 15   ;;  %s555_s14 = smov 17   ;;  %v691_v32 = vld [vmem:[#allocation5] sm:$0xff]  ;;  %vm291_vm1 = vcmp.lt.s32.totalorder %v689_v31, 112  ;;  %vm312_vm2 = vcmp.lt.s32.totalorder %v689_v31, 111  ;;  %vm270_vm3 = vcmp.lt.s32.totalorder %v689_v31, 113 }
  0x10   :  { %449 = vmatmul.msk.f32.vlgmr.msra.gmra.mxu3 %vm63_vm0, %v56_v5  ;;  %60 = vperm.xlu0 %466, %v57_v6   ;;  %v317_v33 = vperm.slane %v691_v32, 7  ;;  %v296_v36 = vperm.slane %v691_v32, 6  ;;  %v275_v41 = vperm.slane %v691_v32, 5  ;;  %vm249_vm4 = vcmp.lt.s32.totalorder %v689_v31, 127  ;;  %s435_s21 = sshll.u32 %s865_s6, 4  ;;  %s436_s21 = int_to_ptr.hbm [resolvable:$true] %s435_s21 }
  0x11   :  { %v254_v48 = vperm.slane %v691_v32, 4  ;;  %v255_v6 = vperm.slane %v721_v54, 4  ;;  %vm228_vm5 = vcmp.lt.s32.totalorder %v689_v31, 1  ;;  %v234_v27 = vperm.slane %v721_v54, 3 }
  0x12   :  { %vm207_vm6 = vcmp.lt.s32.totalorder %v689_v31, 15  ;;  %vm186_vm7 = vcmp.lt.s32.totalorder %v689_v31, 16  ;;  %vm165_vm8 = vcmp.lt.s32.totalorder %v689_v31, 17 }
  0x82   :  { %v61_v7 = vpop.permute.xlu0 %60 }
  0x8b   :  { %v84_v8 = vpop.f32.mrf.mxu0 }
  0x8c   :  { %v85_v9 = vadd.f32 %v84_v8, %v61_v7  ;;  %v104_v11 = vpop.f32.mrf.mxu1 }
  0x8d   :  { %v105_v12 = vadd.f32 %v104_v11, %v61_v7  ;;  %v233_v11 = vperm.slane %v691_v32, 3 }
  0x8e   :  { %v616_v10 = vmax.f32 %v85_v9, 0.0  ;;  %v743_v9 = vld [vmem:[#allocation5 + $0x18] sm:$0xff] }
  0x8f   :  { %v623_v13 = vmax.f32 %v105_v12, 0.0 }
  0x90   :  { %262 = vrot.lane.b32.xlu1 %v616_v10, %s548_s2  ;;  %283 = vrot.lane.b32.xlu2 %v616_v10, %s549_s9 }
  0x91   :  { %304 = vrot.lane.b32.xlu0 %v616_v10, %s550_s10 }
  0x92   :  { %v124_v16 = vpop.f32.mrf.mxu2 }
  0x93   :  { %v144_v14 = vpop.f32.mrf.mxu3  ;;  %v125_v18 = vadd.f32 %v124_v16, %v61_v7 }
  0x94   :  { %v145_v15 = vadd.f32 %v144_v14, %v61_v7  ;;  %v737_v7 = vld [vmem:[#allocation5 + $0x10] sm:$0xff]  ;;  %v320_v14 = vperm.slane %v743_v9, 7 }
  0x95   :  { %v640_v19 = vmax.f32 %v125_v18, 0.0  ;;  %v319_v12 = vperm.slane %v737_v7, 7 }
  0x96   :  { %v635_v17 = vmax.f32 %v145_v15, 0.0  ;;  %v298_v15 = vperm.slane %v737_v7, 6 }
  0x98   :  { %241 = vrot.lane.b32.xlu1 %v616_v10, %s551_s3  ;;  %285 = vrot.lane.b32.xlu2 %v623_v13, %s549_s9 }
  0x99   :  { %222 = vrot.lane.b32.xlu0 %v623_v13, %s552_s11 }
  0xa0   :  { %306 = vrot.lane.b32.xlu1 %v623_v13, %s550_s10  ;;  %180 = vrot.lane.b32.xlu2 %v623_v13, %s553_s12 }
  0xa1   :  { %264 = vrot.lane.b32.xlu0 %v623_v13, %s548_s2 }
  0xa8   :  { %201 = vrot.lane.b32.xlu1 %v623_v13, %s554_s13  ;;  %157 = vrot.lane.b32.xlu2 %v623_v13, %s555_s14 }
  0xa9   :  { %289 = vrot.lane.b32.xlu0 %v635_v17, %s549_s9 }
  0xb0   :  { %243 = vrot.lane.b32.xlu1 %v623_v13, %s551_s3  ;;  %287 = vrot.lane.b32.xlu2 %v640_v19, %s549_s9 }
  0xb1   :  { %268 = vrot.lane.b32.xlu0 %v635_v17, %s548_s2 }
  0xb8   :  { %308 = vrot.lane.b32.xlu1 %v640_v19, %s550_s10  ;;  %266 = vrot.lane.b32.xlu2 %v640_v19, %s548_s2 }
  0xb9   :  { %247 = vrot.lane.b32.xlu0 %v635_v17, %s551_s3 }
  0xc0   :  { %310 = vrot.lane.b32.xlu1 %v635_v17, %s550_s10  ;;  %245 = vrot.lane.b32.xlu2 %v640_v19, %s551_s3 }
  0xc1   :  { %205 = vrot.lane.b32.xlu0 %v635_v17, %s554_s13 }
  0xc8   :  { %224 = vrot.lane.b32.xlu1 %v640_v19, %s552_s11  ;;  %226 = vrot.lane.b32.xlu2 %v635_v17, %s552_s11 }
  0xc9   :  { %182 = vrot.lane.b32.xlu0 %v640_v19, %s553_s12 }
  0xd0   :  { %184 = vrot.lane.b32.xlu1 %v635_v17, %s553_s12  ;;  %203 = vrot.lane.b32.xlu2 %v640_v19, %s554_s13 }
  0xd1   :  { %159 = vrot.lane.b32.xlu0 %v640_v19, %s555_s14 }
  0xd8   :  { %161 = vrot.lane.b32.xlu1 %v635_v17, %s555_s14  ;;  %220 = vrot.lane.b32.xlu2 %v616_v10, %s552_s11 }
  0xd9   :  { %199 = vrot.lane.b32.xlu0 %v616_v10, %s554_s13 }
  0xe0   :  { %178 = vrot.lane.b32.xlu1 %v616_v10, %s553_s12  ;;  %155 = vrot.lane.b32.xlu2 %v616_v10, %s555_s14 }
  0xe1   :  { %329 = vperm.xlu0 %466, %v326_v20  }
  0xea   :  { %v675_v21 = vpop.permute.xlu2 %283 }
  0xf2   :  { %v286_v22 = vpop.permute.xlu2 %285 }
  0xf3   :  { %v294_v37 = vsel %vm291_vm1, %v675_v21, %v286_v22 }
  0xf4   :  { %v300_v43 = vmul.f32 %v296_v36, %v294_v37 }
  0xfa   :  { %v677_v23 = vpop.permute.xlu2 %180 }
 0x102   :  { %v679_v24 = vpop.permute.xlu1 %262  ;;  %v681_v25 = vpop.permute.xlu2 %157 }
 0x103   :  { %v683_v26 = vpop.permute.xlu0 %304 }
 0x10a   :  { %v685_v28 = vpop.permute.xlu1 %241  ;;  %v288_v29 = vpop.permute.xlu2 %287 }
 0x10b   :  { %v687_v30 = vpop.permute.xlu0 %222  ;;  %v293_v59 = vsel %vm291_vm1, %v286_v22, %v288_v29 }
 0x10c   :  { %v301_v5 = vmul.f32 %v297_v58, %v293_v59 }
 0x112   :  { %v307_v34 = vpop.permute.xlu1 %306  ;;  %v696_v35 = vpop.permute.xlu2 %266 }
 0x113   :  { %v315_v38 = vsel %vm312_vm2, %v683_v26, %v307_v34  ;;  %v265_v39 = vpop.permute.xlu0 %264 }
 0x114   :  { %v321_v40 = vmul.f32 %v317_v33, %v315_v38  ;;  %v273_v42 = vsel %vm270_vm3, %v679_v24, %v265_v39  ;;  %v272_v0 = vsel %vm270_vm3, %v265_v39, %v696_v35  ;;  %v299_v33 = vperm.slane %v743_v9, 6 }
 0x115   :  { %v279_v44 = vmul.f32 %v275_v41, %v273_v42 }
 0x116   :  { %343 = vmatpush.msrb.mxu0 %v321_v40 }
 0x118   :  { %344 = vmatpush.msrb.mxu0 %v300_v43  ;;  %v278_v43 = vperm.slane %v743_v9, 5 }
 0x11a   :  { %v710_v45 = vpop.permute.xlu1 %201  ;;  %v712_v46 = vpop.permute.xlu2 %245  ;;  %345 = vmatpush.msrb.mxu0 %v279_v44 }
 0x11b   :  { %v290_v47 = vpop.permute.xlu0 %289 }
 0x11c   :  { %v292_v16 = vsel %vm291_vm1, %v288_v29, %v290_v47  ;;  %v295_v39 = vsel %vm291_vm1, %v290_v47, %v675_v21 }
 0x11d   :  { %v302_v47 = vmul.f32 %v298_v15, %v292_v16 }
 0x122   :  { %v244_v49 = vpop.permute.xlu1 %243  ;;  %v716_v50 = vpop.permute.xlu2 %226 }
 0x123   :  { %v252_v51 = vsel %vm249_vm4, %v685_v28, %v244_v49  ;;  %v269_v52 = vpop.permute.xlu0 %268  ;;  %v251_v8 = vsel %vm249_vm4, %v244_v49, %v712_v46  ;;  %v303_v49 = vmul.f32 %v299_v33, %v295_v39  ;;  %v213_v33 = vperm.slane %v721_v54, 2 }
 0x124   :  { %v258_v53 = vmul.f32 %v254_v48, %v252_v51  ;;  %v259_v22 = vmul.f32 %v255_v6, %v251_v8  ;;  %v271_v44 = vsel %vm270_vm3, %v696_v35, %v269_v52  ;;  %v274_v48 = vsel %vm270_vm3, %v269_v52, %v679_v24 }
 0x125   :  { %v256_v51 = vperm.slane %v737_v7, 4  ;;  %v282_v52 = vmul.f32 %v278_v43, %v274_v48  ;;  %v193_v6 = vperm.slane %v737_v7, 1  ;;  %v192_v43 = vperm.slane %v721_v54, 1 }
 0x126   :  { %346 = vmatpush.msrb.mxu0 %v258_v53  ;;  %v257_v53 = vperm.slane %v743_v9, 4  ;;  %v171_v48 = vperm.slane %v721_v54, 0 }
 0x128   :  { %347 = vmatpush.msrb.mxu0 %v616_v10  ;;  %v280_v10 = vmul.f32 %v276_v63, %v272_v0  ;;  %v215_v63 = vperm.slane %v743_v9, 2 }
 0x12a   :  { %v309_v56 = vpop.permute.xlu1 %308  ;;  %v725_v57 = vpop.permute.xlu2 %203 }
 0x12b   :  { %v314_v60 = vsel %vm312_vm2, %v307_v34, %v309_v56  ;;  %v248_v61 = vpop.permute.xlu0 %247  ;;  %v209_v0 = vsel %vm207_vm6, %v710_v45, %v725_v57 }
 0x12c   :  { %v322_v62 = vmul.f32 %v318_v55, %v314_v60  ;;  %v250_v35 = vsel %vm249_vm4, %v712_v46, %v248_v61  ;;  %v253_v24 = vsel %vm249_vm4, %v248_v61, %v685_v28  ;;  %v235_v60 = vperm.slane %v737_v7, 3 }
 0x12d   :  { %v260_v58 = vmul.f32 %v256_v51, %v250_v35  ;;  %v261_v59 = vmul.f32 %v257_v53, %v253_v24  ;;  %v236_v46 = vperm.slane %v743_v9, 3 }
 0x12e   :  { %363 = vmatpush.msrb.mxu1 %v322_v62  ;;  %v214_v62 = vperm.slane %v737_v7, 2 }
 0x130   :  { %364 = vmatpush.msrb.mxu1 %v301_v5 }
 0x132   :  { %v311_v18 = vpop.permute.xlu1 %310  ;;  %v221_v20 = vpop.permute.xlu2 %220  ;;  %365 = vmatpush.msrb.mxu1 %v280_v10  ;;  %v194_v10 = vperm.slane %v743_v9, 1 }
 0x133   :  { %v313_v34 = vsel %vm312_vm2, %v309_v56, %v311_v18  ;;  %v316_v36 = vsel %vm312_vm2, %v311_v18, %v683_v26  ;;  %v231_v37 = vsel %vm228_vm5, %v221_v20, %v687_v30  ;;  %v232_v29 = vsel %vm228_vm5, %v716_v50, %v221_v20  ;;  %v764_v38 = vpop.permute.xlu0 %205 }
 0x134   :  { %366 = vmatpush.msrb.mxu1 %v259_v22  ;;  %v237_v40 = vmul.f32 %v233_v11, %v232_v29  ;;  %v323_v41 = vmul.f32 %v319_v12, %v313_v34  ;;  %v324_v42 = vmul.f32 %v320_v14, %v316_v36  ;;  %v277_v26 = vperm.slane %v737_v7, 5 }
 0x135   :  { %v238_v21 = vmul.f32 %v234_v27, %v231_v37  ;;  %v218_v11 = vmul.f32 %v214_v62, %v209_v0  ;;  %v173_v22 = vperm.slane %v743_v9, 0  ;;  %v212_v27 = vperm.slane %v691_v32, 2 }
 0x136   :  { %348 = vmatpush.msrb.mxu0 %v237_v40  ;;  %367 = vmatpush.msrb.mxu1 %v623_v13  ;;  %v281_v13 = vmul.f32 %v277_v26, %v271_v44  ;;  %v191_v26 = vperm.slane %v691_v32, 1 }
 0x137   :  { %383 = vmatpush.msrb.mxu2 %v323_v41  ;;  %403 = vmatpush.msrb.mxu3 %v324_v42 }
 0x138   :  { %368 = vmatpush.msrb.mxu1 %v238_v21 }
 0x139   :  { %384 = vmatpush.msrb.mxu2 %v302_v47  ;;  %404 = vmatpush.msrb.mxu3 %v303_v49 }
 0x13a   :  { %v225_v55 = vpop.permute.xlu1 %224  ;;  %v156_v42 = vpop.permute.xlu2 %155 }
 0x13b   :  { %385 = vmatpush.msrb.mxu2 %v281_v13  ;;  %405 = vmatpush.msrb.mxu3 %v282_v52  ;;  %v183_v56 = vpop.permute.xlu0 %182  ;;  %v229_v28 = vsel %vm228_vm5, %v225_v55, %v716_v50  ;;  %v230_v61 = vsel %vm228_vm5, %v687_v30, %v225_v55  ;;  %v208_v50 = vsel %vm207_vm6, %v725_v57, %v764_v38  ;;  %v172_v57 = vperm.slane %v737_v7, 0  ;;  %v325_v7 = vld [vmem:[%s863_s4] sm:$0xff]  ;;  %s556_s4 = smov [#allocation7]  }
 0x13c   :  { %v239_v30 = vmul.f32 %v235_v60, %v230_v61  ;;  %v240_v5 = vmul.f32 %v236_v46, %v229_v28  ;;  %v188_v8 = vsel %vm186_vm7, %v677_v23, %v183_v56  ;;  %v219_v12 = vmul.f32 %v215_v63, %v208_v50  ;;  %s433_s18 = sshll.u32 %s556_s4, 4  ;;  %s434_s18 = int_to_ptr.vmem [resolvable:$true] %s433_s18 }
 0x13d   :  { %386 = vmatpush.msrb.mxu2 %v260_v58  ;;  %406 = vmatpush.msrb.mxu3 %v261_v59  ;;  %v197_v15 = vmul.f32 %v193_v6, %v188_v8 }
 0x13f   :  { %387 = vmatpush.msrb.mxu2 %v640_v19  ;;  %407 = vmatpush.msrb.mxu3 %v635_v17 }
 0x141   :  { %388 = vmatpush.msrb.mxu2 %v239_v30  ;;  %408 = vmatpush.msrb.mxu3 %v240_v5 }
 0x142   :  { %v185_v14 = vpop.permute.xlu1 %184 }
 0x143   :  { %v187_v17 = vsel %vm186_vm7, %v183_v56, %v185_v14  ;;  %389 = vmatpush.msrb.mxu2 %v218_v11  ;;  %409 = vmatpush.msrb.mxu3 %v219_v12  ;;  %v160_v19 = vpop.permute.xlu0 %159 }
 0x144   :  { %v167_v16 = vsel %vm165_vm8, %v681_v25, %v160_v19  ;;  %v198_v18 = vmul.f32 %v194_v10, %v187_v17 }
 0x145   :  { %390 = vmatpush.msrb.mxu2 %v197_v15  ;;  %v176_v20 = vmul.f32 %v172_v57, %v167_v16 }
 0x146   :  { %410 = vmatpush.msrb.mxu3 %v198_v18 }
 0x147   :  { %391 = vmatpush.msrb.mxu2 %v176_v20 }
 0x148   :  { %452 = vmatmul.msk.f32.vlgmr.msrb.gmra.mxu2 %vm332_vm9, %v325_v7 }
 0x14a   :  { %v162_v34 = vpop.permute.xlu1 %161 }
 0x14b   :  { %v166_v36 = vsel %vm165_vm8, %v160_v19, %v162_v34  ;;  %v200_v37 = vpop.permute.xlu0 %199  ;;  %v169_v21 = vsel %vm165_vm8, %v162_v34, %v156_v42 }
 0x14c   :  { %v210_v29 = vsel %vm207_vm6, %v200_v37, %v710_v45  ;;  %v211_v39 = vsel %vm207_vm6, %v764_v38, %v200_v37  ;;  %v177_v40 = vmul.f32 %v173_v22, %v166_v36  ;;  %v170_v45 = vperm.slane %v691_v32, 0 }
 0x14d   :  { %v216_v41 = vmul.f32 %v212_v27, %v211_v39  ;;  %v217_v9 = vmul.f32 %v213_v33, %v210_v29  ;;  %v168_v38 = vsel %vm165_vm8, %v156_v42, %v681_v25 }
 0x14e   :  { %411 = vmatpush.msrb.mxu3 %v177_v40  ;;  %v174_v32 = vmul.f32 %v170_v45, %v169_v21  ;;  %v175_v54 = vmul.f32 %v171_v48, %v168_v38 }
 0x14f   :  { %349 = vmatpush.msrb.mxu0 %v216_v41  ;;  %369 = vmatpush.msrb.mxu1 %v217_v9 }
 0x150   :  { %453 = vmatmul.msk.f32.vlgmr.msrb.gmra.mxu3 %vm332_vm9, %v325_v7 }
 0x152   :  { %v179_v44 = vpop.permute.xlu1 %178 }
 0x153   :  { %v189_v47 = vsel %vm186_vm7, %v179_v44, %v677_v23  ;;  %v190_v49 = vsel %vm186_vm7, %v185_v14, %v179_v44  ;;  %v330_v25 = vpop.permute.xlu0 %329 }
 0x154   :  { %v195_v51 = vmul.f32 %v191_v26, %v190_v49  ;;  %v196_v53 = vmul.f32 %v192_v43, %v189_v47 }
 0x156   :  { %350 = vmatpush.msrb.mxu0 %v195_v51  ;;  %370 = vmatpush.msrb.mxu1 %v196_v53 }
 0x158   :  { %351 = vmatpush.msrb.mxu0 %v174_v32  ;;  %371 = vmatpush.msrb.mxu1 %v175_v54 }
 0x159   :  { %450 = vmatmul.msk.f32.vlgmr.msrb.gmra.mxu0 %vm332_vm9, %v325_v7  ;;  %451 = vmatmul.msk.f32.vlgmr.msrb.gmra.mxu1 %vm332_vm9, %v325_v7 }
 0x1cb   :  { %v393_v35 = vpop.f32.mrf.mxu2 }
 0x1cc   :  { %v394_v24 = vadd.f32 %v393_v35, %v330_v25 }
 0x1ce   :  { %v418_v23 = vadd.f32 %v394_v24, %v602_v3 }
 0x1d0   :  { %v422_v13 = vmax.f32 %v418_v23, 0.0 }
 0x1d2   :  { %426 = vst [vmem:[#allocation7 + $0x10] sm:$0xff] %v422_v13 }
 0x1d3   :  { %v413_v31 = vpop.f32.mrf.mxu3 }
 0x1d4   :  { %v414_v52 = vadd.f32 %v413_v31, %v330_v25 }
 0x1d6   :  { %v419_v55 = vadd.f32 %v414_v52, %v606_v4  ;;  %v353_v56 = vpop.f32.mrf.mxu0  ;;  %v373_v58 = vpop.f32.mrf.mxu1 }
 0x1d7   :  { %v354_v59 = vadd.f32 %v353_v56, %v330_v25  ;;  %v374_v60 = vadd.f32 %v373_v58, %v330_v25 }
 0x1d8   :  { %v423_v46 = vmax.f32 %v419_v55, 0.0 }
 0x1d9   :  { %v416_v28 = vadd.f32 %v354_v59, %v598_v1  ;;  %v417_v61 = vadd.f32 %v374_v60, %v600_v2 }
 0x1da   :  { %427 = vst [vmem:[#allocation7 + $0x18] sm:$0xff] %v423_v46 }
 0x1db   :  { %v420_v3 = vmax.f32 %v416_v28, 0.0  ;;  %v421_v62 = vmax.f32 %v417_v61, 0.0 }
 0x1dd   :  { %424 = vst [vmem:[#allocation7] sm:$0xff] %v420_v3 }
 0x1de   :  { %425 = vst [vmem:[#allocation7 + $0x8] sm:$0xff] %v421_v62 }
 0x1df   :  { %438 = dma.vmem_to_hbm [thread:$0]  %s434_s18, 512, %s436_s21, [#allocation4]  }
 0x1e0   :  { %543 = dma.done.wait [#allocation4], 512  }
 0x1e1   :  { %544 = vsyncadd [#allocation4], 4294966784 }
 0x1e2   :  { %443 = vsyncpa [#allocation3], 1 }
 0x1e3   :  { %444 = vsyncpa [#allocation6], 1 }
 0x1e4   :  { %445 = vsyncpa [#allocation4], 1 }

</bundles_post_ra>
